<compile_context>
chip_gen: v7x
topology: tpu7x:2x2x1
jax: 0.10.0
libtpu: 0.0.40
codegen_flags: <defaults>
</compile_context>

<pallas_src>
import functools
import math

import jax
import jax.numpy as jnp
from jax import lax
from jax.experimental import pallas as pl
from jax.experimental.pallas import tpu as pltpu  # noqa: F401  (CompilerParams once KV tiling is added)


NEG_BIG = -1e9  # cross-batch score bias; exp(NEG_BIG - m) underflows to exactly 0 in f32


# ------------------------------ fused kernel --------------------------------

def _gqa_fused_kernel(x_ref, wqkv_ref, bqkv_ref, wot_ref, bo_ref, bias_ref, o_ref,
                      *, num_kv_heads, queries_per_kv, head_dim, hidden):
    # Single-step kernel over the whole (folded) batch:
    #   x_ref    : (B*S, H)              bf16 activations
    #   wqkv_ref : (H + 2*kv_size, H)    bf16 fused [wq*scale ; wk ; wv], (N, K) layout
    #   bqkv_ref : (1, H + 2*kv_size)    f32 fused [bq*scale ; bk ; bv]
    #   wot_ref  : (H, H)                bf16 out_proj weight, pre-transposed (= wo.T)
    #   bo_ref   : (1, H)                f32
    #   bias_ref : (B*S, B*S)            f32 attention-mask bias + cross-batch -1e9
    #   o_ref    : (B*S, H)              f32 output
    H = hidden
    kv_size = num_kv_heads * head_dim

    # ---- fused QKV projection for the whole batch: y = x @ Wqkv.T + b
    qkv_f32 = lax.dot_general(x_ref[...], wqkv_ref[...], (((1,), (1,)), ((), ())),
                              preferred_element_type=jnp.float32) + bqkv_ref[...]
    # Every later use of q/k/v is an MXU operand -> one bulk cast to bf16.
    qkv = qkv_f32.astype(jnp.bfloat16)          # (B*S, H + 2*kv_size)

    bias = bias_ref[...]                        # (B*S, B*S), hoisted once

    acc = None
    for kv in range(num_kv_heads):
        kc = H + kv * head_dim
        vc = H + kv_size + kv * head_dim
        k_kv = qkv[:, kc:kc + head_dim]         # (B*S, hd)
        v_kv = qkv[:, vc:vc + head_dim]         # (B*S, hd)

        for g in range(queries_per_kv):
            h = kv * queries_per_kv + g
            q_h = qkv[:, h * head_dim:(h + 1) * head_dim]   # (B*S, hd), pre-scaled

            # scores for BOTH batches in one matmul; cross-batch entries get -1e9.
            s = lax.dot_general(q_h, k_kv, (((1,), (1,)), ((), ())),
                                preferred_element_type=jnp.float32) + bias

            # softmax over keys, all f32; reciprocal goes to the EUP slot.
            m = jnp.max(s, axis=-1, keepdims=True)
            e = jnp.exp(s - m)                                  # cross-batch -> exactly 0
            p = e * pl.reciprocal(jnp.sum(e, axis=-1, keepdims=True), approx=True)

            # weighted sum: (B*S, B*S) @ (B*S, hd)
            o_h = jnp.dot(p.astype(jnp.bfloat16), v_kv,
                          preferred_element_type=jnp.float32)    # (B*S, hd)

            # Fold this head's column slab of the output projection in directly:
            # out += o_h @ wo.T[h*hd:(h+1)*hd, :]  -- no attn reassembly needed.
            part = jnp.dot(o_h.astype(jnp.bfloat16),
                           wot_ref[h * head_dim:(h + 1) * head_dim, :],
                           preferred_element_type=jnp.float32)   # (B*S, H)
            acc = part if acc is None else acc + part

    o_ref[...] = acc + bo_ref[...]


# --------------------------- wrapper / param prep ----------------------------

def prepare_params(params, *, num_heads):
    """One-time parameter fusion: concat QKV along N, fold in the attention
    scale, pre-transpose wo, and pre-cast weights to bf16 (biases stay f32)."""
    H = params["wq"].shape[0]
    head_dim = H // num_heads
    scale = 1.0 / math.sqrt(head_dim)
    # (x@wq.T + bq) * scale == x@(wq*scale).T + bq*scale  -> scale is free at init.
    wqkv = jnp.concatenate([params["wq"] * scale, params["wk"], params["wv"]],
                           axis=0).astype(jnp.bfloat16)            # (H+2*kv, H)
    bqkv = jnp.concatenate([params["bq"] * scale, params["bk"], params["bv"]],
                           axis=0)[None, :].astype(jnp.float32)    # (1, H+2*kv)
    wot = params["wo"].T.astype(jnp.bfloat16)                      # (H, H) = wo.T
    bo = params["bo"][None, :].astype(jnp.float32)                 # (1, H)
    return {"wqkv": wqkv, "bqkv": bqkv, "wot": wot, "bo": bo}


def gqa_forward(fused_params, x, attention_mask, *, num_heads, num_kv_heads):
    B, S, H = x.shape
    head_dim = H // num_heads
    qpk = num_heads // num_kv_heads
    BS = B * S

    # Attention-mask bias over keys, plus -1e9 for cross-batch (key, query) pairs
    # so the whole batch can run through one set of matmuls.
    if attention_mask is None:
        key_bias = jnp.zeros((B, S), jnp.float32)
    else:
        key_bias = (1.0 - attention_mask[:, :S].astype(jnp.float32)) * -10000.0
    same_batch = jnp.eye(B, dtype=bool)[:, None, :, None]           # (B,1,B,1)
    bias = jnp.where(same_batch, key_bias[None, None, :, :], NEG_BIG)  # (B,1,B,S)
    bias = jnp.broadcast_to(bias, (B, S, B, S)).reshape(BS, BS)

    x2d = x.reshape(BS, H).astype(jnp.bfloat16)

    kernel = functools.partial(_gqa_fused_kernel,
                               num_kv_heads=num_kv_heads,
                               queries_per_kv=qpk,
                               head_dim=head_dim,
                               hidden=H)

    # Single invocation (no grid): every operand fits fully in VMEM at these
    # sizes, so all per-grid-step overhead is paid exactly once.
    out2d = pl.pallas_call(
        kernel,
        out_shape=jax.ShapeDtypeStruct((BS, H), jnp.float32),
    )(x2d, fused_params["wqkv"], fused_params["bqkv"],
      fused_params["wot"], fused_params["bo"], bias)

    return out2d.reshape(B, S, H)


# ------------------------------ reference (JAX) ------------------------------

def gqa_reference(params, x, attention_mask, *, num_heads, num_kv_heads):
    B, S, H = x.shape
    head_dim = H // num_heads
    qpk = num_heads // num_kv_heads
    q = x @ params["wq"].T + params["bq"]
    k = x @ params["wk"].T + params["bk"]
    v = x @ params["wv"].T + params["bv"]
    q = jnp.transpose(q.reshape(B, S, num_kv_heads, qpk, head_dim), (0, 2, 3, 1, 4))
    k = jnp.transpose(k.reshape(B, S, num_kv_heads, head_dim), (0, 2, 1, 3))
    v = jnp.transpose(v.reshape(B, S, num_kv_heads, head_dim), (0, 2, 1, 3))
    scores = jnp.einsum("bhgqd,bhkd->bhgqk", q, k) / math.sqrt(head_dim)
    if attention_mask is not None:
        bias = (1.0 - attention_mask[:, :S]) * -10000.0
        scores = scores + bias[:, None, None, None, :]
    w = jax.nn.softmax(scores, axis=-1)
    o = jnp.einsum("bhgqk,bhkd->bhgqd", w, v)
    o = jnp.transpose(o, (0, 3, 1, 2, 4)).reshape(B, S, H)
    return o @ params["wo"].T + params["bo"]


# ----------------------------------- main ------------------------------------

if __name__ == "__main__":
    # ModelConfig: hidden_size=64, num_heads=4, num_kv_heads=2, dropout=0.0
    B, S, H = 2, 16, 64
    num_heads, num_kv_heads = 4, 2
    kv_size = H * num_kv_heads // num_heads

    key = jax.random.PRNGKey(0)
    ks = jax.random.split(key, 10)
    params = {
        "wq": jax.random.normal(ks[0], (H, H), jnp.float32) * 0.02,
        "bq": jax.random.normal(ks[1], (H,), jnp.float32) * 0.02,
        "wk": jax.random.normal(ks[2], (kv_size, H), jnp.float32) * 0.02,
        "bk": jax.random.normal(ks[3], (kv_size,), jnp.float32) * 0.02,
        "wv": jax.random.normal(ks[4], (kv_size, H), jnp.float32) * 0.02,
        "bv": jax.random.normal(ks[5], (kv_size,), jnp.float32) * 0.02,
        "wo": jax.random.normal(ks[6], (H, H), jnp.float32) * 0.02,
        "bo": jax.random.normal(ks[7], (H,), jnp.float32) * 0.02,
    }

    x = jax.random.normal(ks[8], (B, S, H), jnp.float32)
    # attention_mask: [B, S], 1 = attend, 0 = masked
    attention_mask = jnp.ones((B, S), jnp.float32).at[1, 12:].set(0.0)

    fused_params = prepare_params(params, num_heads=num_heads)
    fwd = jax.jit(functools.partial(gqa_forward,
                                    num_heads=num_heads,
                                    num_kv_heads=num_kv_heads))
    out = fwd(fused_params, x, attention_mask)
    out = jax.block_until_ready(out)

    ref = gqa_reference(params, x, attention_mask,
                        num_heads=num_heads, num_kv_heads=num_kv_heads)
    err = float(jnp.max(jnp.abs(out - ref)))
    assert out.shape == (B, S, H)
    # bf16 MXU operands + approx reciprocal vs pure-f32 reference
    assert err < 2e-2, f"mismatch vs reference: {err}"

    print("KERNEL_OK")
</pallas_src>

<mosaic_0001>
module attributes {stable_mosaic.version = 11 : i64} {
  func.func @_gqa_fused_kernel(%arg0: memref<32x64xbf16, #tpu.memory_space<vmem>>, %arg1: memref<128x64xbf16, #tpu.memory_space<vmem>>, %arg2: memref<1x128xf32, #tpu.memory_space<vmem>>, %arg3: memref<64x64xbf16, #tpu.memory_space<vmem>>, %arg4: memref<1x64xf32, #tpu.memory_space<vmem>>, %arg5: memref<32x32xf32, #tpu.memory_space<vmem>>, %arg6: memref<32x64xf32, #tpu.memory_space<vmem>>) attributes {dimension_semantics = [], scalar_prefetch = 0 : i64, scratch_operands = 0 : i64, tpu.core_type = #tpu.core_type<tc>} {
    %c0 = arith.constant 0 : index
    %c0_0 = arith.constant 0 : index
    %0 = vector.load %arg0[%c0, %c0_0] : memref<32x64xbf16, #tpu.memory_space<vmem>>, vector<32x64xbf16>
    %c0_1 = arith.constant 0 : index
    %c0_2 = arith.constant 0 : index
    %1 = vector.load %arg1[%c0_1, %c0_2] : memref<128x64xbf16, #tpu.memory_space<vmem>>, vector<128x64xbf16>
    %cst = arith.constant dense<0.000000e+00> : vector<32x128xf32>
    %2 = tpu.matmul %0, %1, %cst {dimension_numbers = #tpu.dot_dimension_numbers<[1], [1], [0], [0], [0, 0, 1, 0], [], []>} : vector<32x64xbf16>, vector<128x64xbf16>, vector<32x128xf32> -> vector<32x128xf32>
    %c0_3 = arith.constant 0 : index
    %c0_4 = arith.constant 0 : index
    %3 = vector.load %arg2[%c0_3, %c0_4] : memref<1x128xf32, #tpu.memory_space<vmem>>, vector<1x128xf32>
    %4 = vector.broadcast %3 : vector<1x128xf32> to vector<32x128xf32>
    %5 = arith.addf %2, %4 : vector<32x128xf32>
    %6 = arith.truncf %5 : vector<32x128xf32> to vector<32x128xbf16>
    %c0_5 = arith.constant 0 : index
    %c0_6 = arith.constant 0 : index
    %7 = vector.load %arg5[%c0_5, %c0_6] : memref<32x32xf32, #tpu.memory_space<vmem>>, vector<32x32xf32>
    %8 = vector.extract_strided_slice %6 {offsets = [0, 64], sizes = [32, 16], strides = [1, 1]} : vector<32x128xbf16> to vector<32x16xbf16>
    %9 = vector.extract_strided_slice %6 {offsets = [0, 96], sizes = [32, 16], strides = [1, 1]} : vector<32x128xbf16> to vector<32x16xbf16>
    %10 = vector.extract_strided_slice %6 {offsets = [0, 0], sizes = [32, 16], strides = [1, 1]} : vector<32x128xbf16> to vector<32x16xbf16>
    %cst_7 = arith.constant dense<0.000000e+00> : vector<32x32xf32>
    %11 = tpu.matmul %10, %8, %cst_7 {dimension_numbers = #tpu.dot_dimension_numbers<[1], [1], [0], [0], [0, 0, 1, 0], [], []>} : vector<32x16xbf16>, vector<32x16xbf16>, vector<32x32xf32> -> vector<32x32xf32>
    %12 = arith.addf %11, %7 : vector<32x32xf32>
    %cst_8 = arith.constant dense<0xFF800000> : vector<32xf32>
    %13 = vector.multi_reduction <maximumf>, %12, %cst_8 [1] : vector<32x32xf32> to vector<32xf32>
    %14 = vector.shape_cast %13 : vector<32xf32> to vector<32x1xf32>
    %15 = vector.broadcast %14 : vector<32x1xf32> to vector<32x32xf32>
    %16 = arith.subf %12, %15 : vector<32x32xf32>
    %17 = math.exp %16 : vector<32x32xf32>
    %cst_9 = arith.constant dense<0.000000e+00> : vector<32xf32>
    %18 = vector.multi_reduction <add>, %17, %cst_9 [1] : vector<32x32xf32> to vector<32xf32>
    %19 = vector.shape_cast %18 : vector<32xf32> to vector<32x1xf32>
    %20 = tpu.reciprocal %19 {approx = true} : vector<32x1xf32> -> vector<32x1xf32>
    %21 = vector.broadcast %20 : vector<32x1xf32> to vector<32x32xf32>
    %22 = arith.mulf %17, %21 : vector<32x32xf32>
    %23 = arith.truncf %22 : vector<32x32xf32> to vector<32x32xbf16>
    %cst_10 = arith.constant dense<0.000000e+00> : vector<32x16xf32>
    %24 = tpu.matmul %23, %9, %cst_10 {dimension_numbers = #tpu.dot_dimension_numbers<[1], [0], [0], [1], [0, 0, 1, 1], [], []>} : vector<32x32xbf16>, vector<32x16xbf16>, vector<32x16xf32> -> vector<32x16xf32>
    %25 = arith.truncf %24 : vector<32x16xf32> to vector<32x16xbf16>
    %c0_11 = arith.constant 0 : index
    %c0_12 = arith.constant 0 : index
    %26 = vector.load %arg3[%c0_11, %c0_12] : memref<64x64xbf16, #tpu.memory_space<vmem>>, vector<16x64xbf16>
    %cst_13 = arith.constant dense<0.000000e+00> : vector<32x64xf32>
    %27 = tpu.matmul %25, %26, %cst_13 {dimension_numbers = #tpu.dot_dimension_numbers<[1], [0], [0], [1], [0, 0, 1, 1], [], []>} : vector<32x16xbf16>, vector<16x64xbf16>, vector<32x64xf32> -> vector<32x64xf32>
    %28 = vector.extract_strided_slice %6 {offsets = [0, 16], sizes = [32, 16], strides = [1, 1]} : vector<32x128xbf16> to vector<32x16xbf16>
    %cst_14 = arith.constant dense<0.000000e+00> : vector<32x32xf32>
    %29 = tpu.matmul %28, %8, %cst_14 {dimension_numbers = #tpu.dot_dimension_numbers<[1], [1], [0], [0], [0, 0, 1, 0], [], []>} : vector<32x16xbf16>, vector<32x16xbf16>, vector<32x32xf32> -> vector<32x32xf32>
    %30 = arith.addf %29, %7 : vector<32x32xf32>
    %cst_15 = arith.constant dense<0xFF800000> : vector<32xf32>
    %31 = vector.multi_reduction <maximumf>, %30, %cst_15 [1] : vector<32x32xf32> to vector<32xf32>
    %32 = vector.shape_cast %31 : vector<32xf32> to vector<32x1xf32>
    %33 = vector.broadcast %32 : vector<32x1xf32> to vector<32x32xf32>
    %34 = arith.subf %30, %33 : vector<32x32xf32>
    %35 = math.exp %34 : vector<32x32xf32>
    %cst_16 = arith.constant dense<0.000000e+00> : vector<32xf32>
    %36 = vector.multi_reduction <add>, %35, %cst_16 [1] : vector<32x32xf32> to vector<32xf32>
    %37 = vector.shape_cast %36 : vector<32xf32> to vector<32x1xf32>
    %38 = tpu.reciprocal %37 {approx = true} : vector<32x1xf32> -> vector<32x1xf32>
    %39 = vector.broadcast %38 : vector<32x1xf32> to vector<32x32xf32>
    %40 = arith.mulf %35, %39 : vector<32x32xf32>
    %41 = arith.truncf %40 : vector<32x32xf32> to vector<32x32xbf16>
    %cst_17 = arith.constant dense<0.000000e+00> : vector<32x16xf32>
    %42 = tpu.matmul %41, %9, %cst_17 {dimension_numbers = #tpu.dot_dimension_numbers<[1], [0], [0], [1], [0, 0, 1, 1], [], []>} : vector<32x32xbf16>, vector<32x16xbf16>, vector<32x16xf32> -> vector<32x16xf32>
    %43 = arith.truncf %42 : vector<32x16xf32> to vector<32x16xbf16>
    %c16 = arith.constant 16 : index
    %c0_18 = arith.constant 0 : index
    %44 = vector.load %arg3[%c16, %c0_18] : memref<64x64xbf16, #tpu.memory_space<vmem>>, vector<16x64xbf16>
    %cst_19 = arith.constant dense<0.000000e+00> : vector<32x64xf32>
    %45 = tpu.matmul %43, %44, %cst_19 {dimension_numbers = #tpu.dot_dimension_numbers<[1], [0], [0], [1], [0, 0, 1, 1], [], []>} : vector<32x16xbf16>, vector<16x64xbf16>, vector<32x64xf32> -> vector<32x64xf32>
    %46 = arith.addf %27, %45 : vector<32x64xf32>
    %47 = vector.extract_strided_slice %6 {offsets = [0, 80], sizes = [32, 16], strides = [1, 1]} : vector<32x128xbf16> to vector<32x16xbf16>
    %48 = vector.extract_strided_slice %6 {offsets = [0, 112], sizes = [32, 16], strides = [1, 1]} : vector<32x128xbf16> to vector<32x16xbf16>
    %49 = vector.extract_strided_slice %6 {offsets = [0, 32], sizes = [32, 16], strides = [1, 1]} : vector<32x128xbf16> to vector<32x16xbf16>
    %cst_20 = arith.constant dense<0.000000e+00> : vector<32x32xf32>
    %50 = tpu.matmul %49, %47, %cst_20 {dimension_numbers = #tpu.dot_dimension_numbers<[1], [1], [0], [0], [0, 0, 1, 0], [], []>} : vector<32x16xbf16>, vector<32x16xbf16>, vector<32x32xf32> -> vector<32x32xf32>
    %51 = arith.addf %50, %7 : vector<32x32xf32>
    %cst_21 = arith.constant dense<0xFF800000> : vector<32xf32>
    %52 = vector.multi_reduction <maximumf>, %51, %cst_21 [1] : vector<32x32xf32> to vector<32xf32>
    %53 = vector.shape_cast %52 : vector<32xf32> to vector<32x1xf32>
    %54 = vector.broadcast %53 : vector<32x1xf32> to vector<32x32xf32>
    %55 = arith.subf %51, %54 : vector<32x32xf32>
    %56 = math.exp %55 : vector<32x32xf32>
    %cst_22 = arith.constant dense<0.000000e+00> : vector<32xf32>
    %57 = vector.multi_reduction <add>, %56, %cst_22 [1] : vector<32x32xf32> to vector<32xf32>
    %58 = vector.shape_cast %57 : vector<32xf32> to vector<32x1xf32>
    %59 = tpu.reciprocal %58 {approx = true} : vector<32x1xf32> -> vector<32x1xf32>
    %60 = vector.broadcast %59 : vector<32x1xf32> to vector<32x32xf32>
    %61 = arith.mulf %56, %60 : vector<32x32xf32>
    %62 = arith.truncf %61 : vector<32x32xf32> to vector<32x32xbf16>
    %cst_23 = arith.constant dense<0.000000e+00> : vector<32x16xf32>
    %63 = tpu.matmul %62, %48, %cst_23 {dimension_numbers = #tpu.dot_dimension_numbers<[1], [0], [0], [1], [0, 0, 1, 1], [], []>} : vector<32x32xbf16>, vector<32x16xbf16>, vector<32x16xf32> -> vector<32x16xf32>
    %64 = arith.truncf %63 : vector<32x16xf32> to vector<32x16xbf16>
    %c32 = arith.constant 32 : index
    %c0_24 = arith.constant 0 : index
    %65 = vector.load %arg3[%c32, %c0_24] : memref<64x64xbf16, #tpu.memory_space<vmem>>, vector<16x64xbf16>
    %cst_25 = arith.constant dense<0.000000e+00> : vector<32x64xf32>
    %66 = tpu.matmul %64, %65, %cst_25 {dimension_numbers = #tpu.dot_dimension_numbers<[1], [0], [0], [1], [0, 0, 1, 1], [], []>} : vector<32x16xbf16>, vector<16x64xbf16>, vector<32x64xf32> -> vector<32x64xf32>
    %67 = arith.addf %46, %66 : vector<32x64xf32>
    %68 = vector.extract_strided_slice %6 {offsets = [0, 48], sizes = [32, 16], strides = [1, 1]} : vector<32x128xbf16> to vector<32x16xbf16>
    %cst_26 = arith.constant dense<0.000000e+00> : vector<32x32xf32>
    %69 = tpu.matmul %68, %47, %cst_26 {dimension_numbers = #tpu.dot_dimension_numbers<[1], [1], [0], [0], [0, 0, 1, 0], [], []>} : vector<32x16xbf16>, vector<32x16xbf16>, vector<32x32xf32> -> vector<32x32xf32>
    %70 = arith.addf %69, %7 : vector<32x32xf32>
    %cst_27 = arith.constant dense<0xFF800000> : vector<32xf32>
    %71 = vector.multi_reduction <maximumf>, %70, %cst_27 [1] : vector<32x32xf32> to vector<32xf32>
    %72 = vector.shape_cast %71 : vector<32xf32> to vector<32x1xf32>
    %73 = vector.broadcast %72 : vector<32x1xf32> to vector<32x32xf32>
    %74 = arith.subf %70, %73 : vector<32x32xf32>
    %75 = math.exp %74 : vector<32x32xf32>
    %cst_28 = arith.constant dense<0.000000e+00> : vector<32xf32>
    %76 = vector.multi_reduction <add>, %75, %cst_28 [1] : vector<32x32xf32> to vector<32xf32>
    %77 = vector.shape_cast %76 : vector<32xf32> to vector<32x1xf32>
    %78 = tpu.reciprocal %77 {approx = true} : vector<32x1xf32> -> vector<32x1xf32>
    %79 = vector.broadcast %78 : vector<32x1xf32> to vector<32x32xf32>
    %80 = arith.mulf %75, %79 : vector<32x32xf32>
    %81 = arith.truncf %80 : vector<32x32xf32> to vector<32x32xbf16>
    %cst_29 = arith.constant dense<0.000000e+00> : vector<32x16xf32>
    %82 = tpu.matmul %81, %48, %cst_29 {dimension_numbers = #tpu.dot_dimension_numbers<[1], [0], [0], [1], [0, 0, 1, 1], [], []>} : vector<32x32xbf16>, vector<32x16xbf16>, vector<32x16xf32> -> vector<32x16xf32>
    %83 = arith.truncf %82 : vector<32x16xf32> to vector<32x16xbf16>
    %c48 = arith.constant 48 : index
    %c0_30 = arith.constant 0 : index
    %84 = vector.load %arg3[%c48, %c0_30] : memref<64x64xbf16, #tpu.memory_space<vmem>>, vector<16x64xbf16>
    %cst_31 = arith.constant dense<0.000000e+00> : vector<32x64xf32>
    %85 = tpu.matmul %83, %84, %cst_31 {dimension_numbers = #tpu.dot_dimension_numbers<[1], [0], [0], [1], [0, 0, 1, 1], [], []>} : vector<32x16xbf16>, vector<16x64xbf16>, vector<32x64xf32> -> vector<32x64xf32>
    %86 = arith.addf %67, %85 : vector<32x64xf32>
    %c0_32 = arith.constant 0 : index
    %c0_33 = arith.constant 0 : index
    %87 = vector.load %arg4[%c0_32, %c0_33] : memref<1x64xf32, #tpu.memory_space<vmem>>, vector<1x64xf32>
    %88 = vector.broadcast %87 : vector<1x64xf32> to vector<32x64xf32>
    %89 = arith.addf %86, %88 : vector<32x64xf32>
    %c0_34 = arith.constant 0 : index
    %c0_35 = arith.constant 0 : index
    %90 = vector.load %arg6[%c0_34, %c0_35] : memref<32x64xf32, #tpu.memory_space<vmem>>, vector<32x64xf32>
    tpu.vector_store %arg6[%c0_34, %c0_35], %89 {strides = array<i32>} : memref<32x64xf32, #tpu.memory_space<vmem>>, vector<32x64xf32>,
    return
  }
}

</mosaic_0001>

<bundles_post_ra>
// kernel: gqa_forward.1
= control target key start
LH: loop header
LB: loop body
LE: loop exit
PB: predicated region body
PF: predicated region fallthrough
CT: control target
= control target key end

     0   :  { %vm102_vm0 = vcmask 523264   ;;  %s1808_s0 = inlined_call_operand.vmem [shape: bf16[32,64], index: 0, kind: input, shape index: {}]   ;;  %s1809_s1 = inlined_call_operand.vmem [shape: bf16[128,64], index: 1, kind: input, shape index: {}]   ;;  %s1810_s2 = inlined_call_operand.vmem [shape: f32[1,128], index: 2, kind: input, shape index: {}]   ;;  %s1811_s3 = inlined_call_operand.vmem [shape: bf16[64,64], index: 3, kind: input, shape index: {}]   ;;  %s1812_s4 = inlined_call_operand.vmem [shape: f32[1,64], index: 4, kind: input, shape index: {}]   ;;  %s1813_s5 = inlined_call_operand.vmem [shape: f32[32,32], index: 5, kind: input, shape index: {}]   ;;  %s1814_s6 = inlined_call_operand.hbm [shape: f32[32,64], index: 6, kind: output, shape index: {}]  }
   0x1   :  { %v1401_v0 = vld [vmem:[%s1809_s1] sm:$0xff]   ;;  %v1402_v1 = vld [vmem:[%s1809_s1 + $0x8] sm:$0xff]   ;;  %v1403_v3 = vld [vmem:[%s1809_s1 + $0x10] sm:$0xff]  }
   0x2   :  { %1375 = vmatprep.subr.msk.bf16.mxu0 %vm102_vm0, %v1401_v0  ;;  %v110_v2 = vsel %vm102_vm0, %v1401_v0, 0  ;;  %v113_v4 = vsel %vm102_vm0, %v1402_v1, 0  ;;  %v1409_v5 = vld [vmem:[%s1808_s0] sm:$0xff]  }
   0x3   :  { %1256 = vmatpush3.bf16.xpose.msra.mxu0 %v110_v2  ;;  %1271 = vmatprep.mubr.msk.bf16.mxu0 %vm102_vm0, %v1409_v5 }
   0x4   :  { %1376 = vmatprep.subr.msk.bf16.mxu0 %vm102_vm0, %v1402_v1 }
   0xb   :  { %1258 = vmatpush3.bf16.xpose.msra.mxu0 %v113_v4 }
   0xc   :  { %1377 = vmatprep.subr.msk.bf16.mxu0 %vm102_vm0, %v1403_v3 }
   0xd   :  { %11 = vsyncpa [#allocation3], 0  ;;  %v116_v6 = vsel %vm102_vm0, %v1403_v3, 0  ;;  %v1404_v7 = vld [vmem:[%s1809_s1 + $0x18] sm:$0xff]   ;;  %v1405_v9 = vld [vmem:[%s1809_s1 + $0x20] sm:$0xff]   ;;  %vm194_vm1 = vcmask 130048  }
   0xe   :  { %v119_v8 = vsel %vm102_vm0, %v1404_v7, 0  ;;  %v122_v10 = vsel %vm102_vm0, %v1405_v9, 0  ;;  %v1406_v11 = vld [vmem:[%s1809_s1 + $0x28] sm:$0xff]   ;;  %v1407_v13 = vld [vmem:[%s1809_s1 + $0x30] sm:$0xff]   ;;  %v1408_v15 = vld [vmem:[%s1809_s1 + $0x38] sm:$0xff]   ;;  %vm256_vm2 = vcmask 261120  }
   0xf   :  { %v125_v12 = vsel %vm102_vm0, %v1406_v11, 0  ;;  %v128_v14 = vsel %vm102_vm0, %v1407_v13, 0  ;;  %v131_v16 = vsel %vm102_vm0, %v1408_v15, 0  ;;  %v1410_v17 = vld [vmem:[%s1808_s0 + $0x8] sm:$0xff]   ;;  %v1159_v19 = vld [vmem:[%s1810_s2] ss:$0 sm:$0xff] }
  0x10   :  { %s1503_s0 = smov 64   ;;  %v1630_v33 = vld [vmem:[%s1813_s5 + $0x10] sm:$0xff]  ;;  %v1635_v34 = vld [vmem:[%s1813_s5] sm:$0xff]  ;;  %v1641_v38 = vld [vmem:[%s1813_s5 + $0x8] sm:$0xff]  ;;  %s1504_s25 = smov 32  }
  0x11   :  { %v1650_v45 = vld [vmem:[%s1813_s5 + $0x18] sm:$0xff]  ;;  %s1505_s26 = smov 96   ;;  %s1506_s5 = smov 112  }
  0x12   :  { %s1507_s27 = smov 48   ;;  %s1508_s28 = smov 80  }
  0x13   :  { %1260 = vmatpush3.bf16.xpose.msra.mxu0 %v116_v6  ;;  %s1509_s29 = smov 16   ;;  %s1510_s15 = smov [#allocation2]  }
  0x14   :  { %1378 = vmatprep.subr.msk.bf16.mxu0 %vm102_vm0, %v1404_v7  ;;  %s1148_s16 = sshll.u32 %s1510_s15, 4  ;;  %s1149_s16 = int_to_ptr.vmem [resolvable:$true] %s1148_s16 }
  0x15   :  { %p1484_p1 = scmp.lt.s32.totalorder %s1149_s16, %s1149_s16 }
  0x1b   :  { %1262 = vmatpush3.bf16.xpose.msra.mxu0 %v119_v8 }
  0x1c   :  { %1379 = vmatprep.subr.msk.bf16.mxu0 %vm102_vm0, %v1405_v9 }
  0x23   :  { %1264 = vmatpush3.bf16.xpose.msra.mxu0 %v122_v10 }
  0x24   :  { %1380 = vmatprep.subr.msk.bf16.mxu0 %vm102_vm0, %v1406_v11 }
  0x2b   :  { %1266 = vmatpush3.bf16.xpose.msra.mxu0 %v125_v12 }
  0x2c   :  { %1381 = vmatprep.subr.msk.bf16.mxu0 %vm102_vm0, %v1407_v13 }
  0x33   :  { %1268 = vmatpush3.bf16.xpose.msra.mxu0 %v128_v14 }
  0x34   :  { %1382 = vmatprep.subr.msk.bf16.mxu0 %vm102_vm0, %v1408_v15 }
  0x3b   :  { %1270 = vmatpush3.bf16.xpose.msra.mxu0 %v131_v16 }
  0x42   :  { %1272 = vmatmul.mubr.msk.bf16.vlgmr.msra.gmra.mrb[0].mxu0 %vm102_vm0, %v1410_v17 }
 0x115   :  { %v1273_v18 = vpop.f32.mrb[0].mxu0 }
 0x116   :  { %v167_v20 = vpop.f32.mrb[1].mxu0  ;;  %v176_v22 = vadd.f32 %v1273_v18, %v1159_v19 }
 0x117   :  { %v1274_v21 = vpop.f32.mrb[2].mxu0  ;;  %v168_v25 = vadd.f32 %v1159_v19, %v167_v20 }
 0x118   :  { %v179_v23 = vadd.f32 %v1274_v21, %v1159_v19  ;;  %v170_v24 = vpop.f32.mrb[3].mxu0 }
 0x119   :  { %v171_v26 = vadd.f32 %v1159_v19, %v170_v24 }
 0x11a   :  { %v1599_v27 = vpack.c.bf16 %v179_v23, %v176_v22 }
 0x11b   :  { %v1601_v28 = vpack.c.bf16 %v171_v26, %v168_v25 }
 0x11d   :  { %190 = vrot.lane.b32.xlu0 %v1601_v28, %s1503_s0  ;;  %1279 = vmatprep.mubr.msk.bf16.mxu1 %vm194_vm1, %v1601_v28 }
 0x121   :  { %192 = vrot.lane.b32.xlu0 %v1599_v27, %s1503_s0 }
 0x18f   :  { %v1607_v29 = vpop.permute.xlu0 %190 }
 0x190   :  { %1383 = vmatprep.subr.msk.bf16.mxu1 %vm194_vm1, %v1607_v29  ;;  %v1613_v30 = vsel %vm194_vm1, %v1607_v29, 0 }
 0x191   :  { %1276 = vmatpush3.bf16.xpose.msra.mxu1 %v1613_v30 }
 0x193   :  { %v1616_v31 = vpop.permute.xlu0 %192 }
 0x194   :  { %1384 = vmatprep.subr.msk.bf16.mxu1 %vm194_vm1, %v1616_v31  ;;  %v1622_v32 = vsel %vm194_vm1, %v1616_v31, 0 }
 0x199   :  { %1278 = vmatpush3.bf16.xpose.msra.mxu1 %v1622_v32 }
 0x1a0   :  { %1280 = vmatmul.mubr.msk.bf16.vlgmr.msra.gmra.mrb[0].mxu1 %vm194_vm1, %v1599_v27 }
 0x273   :  { %v1281_v35 = vpop.f32.mrb[0].mxu1 }
 0x274   :  { %v250_v36 = vadd.f32 %v1281_v35, %v1630_v33  ;;  %v241_v37 = vpop.f32.mrb[1].mxu1 }
 0x275   :  { %v242_v39 = vadd.f32 %v241_v37, %v1635_v34  ;;  %v1282_v40 = vpop.f32.mrb[2].mxu1 }
 0x276   :  { %v244_v41 = vpop.f32.mrb[3].mxu1  ;;  %v263_v42 = vsel %vm256_vm2, %v250_v36, -inf  ;;  %v253_v46 = vadd.f32 %v1282_v40, %v1650_v45 }
 0x277   :  { %v245_v43 = vadd.f32 %v244_v41, %v1641_v38  ;;  %264 = vmax.xlane.f32.xlu0 %v263_v42  ;;  %v257_v44 = vsel %vm256_vm2, %v242_v39, -inf }
 0x278   :  { %258 = vmax.xlane.f32.xlu1 %v257_v44  ;;  %v266_v48 = vsel %vm256_vm2, %v253_v46, -inf }
 0x279   :  { %v260_v47 = vsel %vm256_vm2, %v245_v43, -inf }
 0x27c   :  { %261 = vmax.xlane.f32.xlu1 %v260_v47 }
 0x280   :  { %267 = vmax.xlane.f32.xlu1 %v266_v48 }
 0x28d   :  { %305 = vrot.lane.b32.xlu0 %v1599_v27, %s1504_s25 }
 0x291   :  { %654 = vrot.lane.b32.xlu0 %v1601_v28, %s1505_s26 }
 0x304   :  { %v265_v49 = vpop.xlane.xlu0 %264 }
 0x305   :  { %v271_v50 = vsub.f32 %v250_v36, %v265_v49  ;;  %v259_v51 = vpop.xlane.xlu1 %258 }
 0x306   :  { %v269_v52 = vsub.f32 %v242_v39, %v259_v51 }
 0x307   :  { %v277_v53 = vmul.f32 1.442695, %v271_v50 }
 0x308   :  { %v273_v54 = vmul.f32 1.442695, %v269_v52  ;;  %v1659_v55 = vpop.permute.xlu0 %305 }
 0x309   :  { %1415 = vpow2.f32 %v277_v53  ;;  %v262_v56 = vpop.xlane.xlu1 %261 }
 0x30a   :  { %1417 = vpow2.f32 %v273_v54  ;;  %v270_v57 = vsub.f32 %v245_v43, %v262_v56 }
 0x30c   :  { %v655_v58 = vpop.permute.xlu0 %654  ;;  %v275_v61 = vmul.f32 1.442695, %v270_v57 }
 0x30d   :  { %1323 = vmatprep.mubr.msk.bf16.mxu0 %vm194_vm1, %v655_v58  ;;  %v268_v59 = vpop.xlane.xlu1 %267 }
 0x30e   :  { %v272_v60 = vsub.f32 %v253_v46, %v268_v59 }
 0x310   :  { %v279_v62 = vmul.f32 1.442695, %v272_v60 }
 0x312   :  { %1419 = vpow2.f32 %v279_v62 }
 0x313   :  { %v1416_v63 = vpop.eup %1415  ;;  %1421 = vpow2.f32 %v275_v61 }
 0x314   :  { %v287_v0 = vsel %vm256_vm2, %v1416_v63, 0.0  ;;  %v1418_v1 = vpop.eup %1417 }
 0x315   :  { %288 = vadd.xlane.f32.xlu1 %v287_v0  ;;  %v281_v2 = vsel %vm256_vm2, %v1418_v1, 0.0 }
 0x319   :  { %282 = vadd.xlane.f32.xlu1 %v281_v2 }
 0x31c   :  { %v1420_v3 = vpop.eup %1419 }
 0x31d   :  { %v290_v4 = vsel %vm256_vm2, %v1420_v3, 0.0  ;;  %v1422_v5 = vpop.eup %1421 }
 0x31e   :  { %291 = vadd.xlane.f32.xlu1 %v290_v4  ;;  %v284_v6 = vsel %vm256_vm2, %v1422_v5, 0.0 }
 0x322   :  { %285 = vadd.xlane.f32.xlu1 %v284_v6 }
 0x333   :  { %303 = vrot.lane.b32.xlu1 %v1601_v28, %s1504_s25 }
 0x337   :  { %368 = vrot.lane.b32.xlu1 %v1601_v28, %s1506_s5 }
 0x33b   :  { %370 = vrot.lane.b32.xlu1 %v1599_v27, %s1506_s5 }
 0x33f   :  { %658 = vrot.lane.b32.xlu1 %v1601_v28, %s1507_s27 }
 0x343   :  { %660 = vrot.lane.b32.xlu1 %v1599_v27, %s1507_s27 }
 0x347   :  { %656 = vrot.lane.b32.xlu1 %v1599_v27, %s1505_s26 }
 0x3a2   :  { %v289_v7 = vpop.xlane.xlu1 %288 }
 0x3a6   :  { %v283_v8 = vpop.xlane.xlu1 %282 }
 0x3ab   :  { %v292_v9 = vpop.xlane.xlu1 %291 }
 0x3ac   :  { %1423 = vrcp.f32 %v292_v9 }
 0x3ad   :  { %1425 = vrcp.f32 %v283_v8 }
 0x3ae   :  { %1427 = vrcp.f32 %v289_v7 }
 0x3af   :  { %v286_v10 = vpop.xlane.xlu1 %285 }
 0x3b0   :  { %1429 = vrcp.f32 %v286_v10 }
 0x3b3   :  { %v304_v11 = vpop.permute.xlu1 %303 }
 0x3b4   :  { %1283 = vmatprep.subr.bf16.mxu1 %v304_v11 }
 0x3b5   :  { %1284 = vmatpush3.bf16.msra.mxu1 %v304_v11 }
 0x3b6   :  { %1285 = vmatprep.subr.bf16.mxu1 %v1659_v55  ;;  %v1424_v12 = vpop.eup %1423 }
 0x3b7   :  { %v369_v13 = vpop.permute.xlu1 %368  ;;  %v1426_v14 = vpop.eup %1425  ;;  %v300_v17 = vmul.f32 %v1424_v12, %v1420_v3 }
 0x3b8   :  { %v1428_v15 = vpop.eup %1427  ;;  %v297_v19 = vmul.f32 %v1426_v14, %v1418_v1 }
 0x3b9   :  { %1286 = vmatpush3.bf16.msra.mxu1 %v1659_v55  ;;  %v299_v21 = vmul.f32 %v1428_v15, %v1416_v63 }
 0x3ba   :  { %v1430_v16 = vpop.eup %1429  ;;  %1385 = vmatprep.subr.msk.bf16.mxu1 %vm194_vm1, %v1607_v29 }
 0x3bb   :  { %v371_v18 = vpop.permute.xlu1 %370  ;;  %v298_v20 = vmul.f32 %v1430_v16, %v1422_v5  ;;  %v302_v23 = vpack.c.bf16 %v300_v17, %v299_v21 }
 0x3bd   :  { %v301_v22 = vpack.c.bf16 %v298_v20, %v297_v19 }
 0x3bf   :  { %1287 = vmatprep.mubr.msk.bf16.mxu1 %vm256_vm2, %v301_v22  ;;  %v659_v24 = vpop.permute.xlu1 %658 }
 0x3c0   :  { %1288 = vmatmul.mubr.msk.bf16.vlgmr.msra.gmra.mrb[4].mxu1 %vm256_vm2, %v302_v23  ;;  %1387 = vmatprep.subr.msk.bf16.mxu0 %vm194_vm1, %v659_v24  ;;  %v669_v25 = vsel %vm194_vm1, %v659_v24, 0 }
 0x3c1   :  { %1295 = vmatprep.mubr.msk.bf16.mxu1 %vm194_vm1, %v369_v13  ;;  %1320 = vmatpush3.bf16.xpose.msra.mxu0 %v669_v25 }
 0x3c2   :  { %1292 = vmatpush3.bf16.xpose.msra.mxu1 %v1613_v30 }
 0x3c3   :  { %1386 = vmatprep.subr.msk.bf16.mxu1 %vm194_vm1, %v1616_v31  ;;  %v661_v26 = vpop.permute.xlu1 %660 }
 0x3c4   :  { %1388 = vmatprep.subr.msk.bf16.mxu0 %vm194_vm1, %v661_v26  ;;  %v672_v29 = vsel %vm194_vm1, %v661_v26, 0 }
 0x3c7   :  { %v657_v35 = vpop.permute.xlu1 %656 }
 0x3c9   :  { %1322 = vmatpush3.bf16.xpose.msra.mxu0 %v672_v29 }
 0x3ca   :  { %1294 = vmatpush3.bf16.xpose.msra.mxu1 %v1622_v32  ;;  %1389 = vmatprep.subr.msk.bf16.mxu0 %vm194_vm1, %v659_v24 }
 0x3cb   :  { %1299 = vmatprep.subr.bf16.mxu1 %v304_v11 }
 0x3d0   :  { %1324 = vmatmul.mubr.msk.bf16.vlgmr.msra.gmra.mrb[4].mxu0 %vm194_vm1, %v657_v35 }
 0x3d1   :  { %1296 = vmatmul.mubr.msk.bf16.vlgmr.msra.gmra.mrb[8].mxu1 %vm194_vm1, %v371_v18  ;;  %1342 = vmatpush3.bf16.xpose.msra.mxu0 %v669_v25 }
 0x3d2   :  { %1300 = vmatpush3.bf16.msra.mxu1 %v304_v11  ;;  %1390 = vmatprep.subr.msk.bf16.mxu0 %vm194_vm1, %v661_v26 }
 0x3d3   :  { %1301 = vmatprep.subr.bf16.mxu1 %v1659_v55 }
 0x3d6   :  { %1302 = vmatpush3.bf16.msra.mxu1 %v1659_v55 }
 0x3d9   :  { %1344 = vmatpush3.bf16.xpose.msra.mxu0 %v672_v29 }
 0x493   :  { %v1695_v30 = vpop.f32.mrb[4].mxu1 }
 0x494   :  { %v1697_v31 = vpop.f32.mrb[5].mxu1 }
 0x495   :  { %v1699_v32 = vpop.f32.mrb[6].mxu1 }
 0x496   :  { %v365_v36 = vpack.c.bf16 %v1699_v32, %v1695_v30  ;;  %v1703_v37 = vpop.f32.mrb[7].mxu1 }
 0x497   :  { %v364_v39 = vpack.c.bf16 %v1703_v37, %v1697_v31  ;;  %v1413_v37 = vld [vmem:[%s1811_s3 + $0x10] sm:$0xff]  }
 0x4a3   :  { %v1325_v40 = vpop.f32.mrb[4].mxu0 }
 0x4a4   :  { %v1297_v41 = vpop.f32.mrb[8].mxu1  ;;  %v708_v42 = vpop.f32.mrb[5].mxu0  ;;  %v717_v14 = vadd.f32 %v1325_v40, %v1630_v33 }
 0x4a5   :  { %v412_v43 = vpop.f32.mrb[9].mxu1  ;;  %v1326_v44 = vpop.f32.mrb[6].mxu0  ;;  %v421_v50 = vadd.f32 %v1297_v41, %v1630_v33  ;;  %v709_v13 = vadd.f32 %v708_v42, %v1635_v34 }
 0x4a6   :  { %v413_v46 = vadd.f32 %v412_v43, %v1635_v34  ;;  %v1298_v47 = vpop.f32.mrb[10].mxu1  ;;  %v711_v48 = vpop.f32.mrb[7].mxu0  ;;  %v720_v17 = vadd.f32 %v1326_v44, %v1650_v45  ;;  %v729_v18 = vsel %vm256_vm2, %v717_v14, -inf }
 0x4a7   :  { %v415_v49 = vpop.f32.mrb[11].mxu1  ;;  %v424_v54 = vadd.f32 %v1298_v47, %v1650_v45  ;;  %v433_v55 = vsel %vm256_vm2, %v421_v50, -inf  ;;  %v712_v15 = vadd.f32 %v711_v48, %v1641_v38  ;;  %v723_v16 = vsel %vm256_vm2, %v709_v13, -inf }
 0x4a8   :  { %v416_v51 = vadd.f32 %v415_v49, %v1641_v38  ;;  %v427_v52 = vsel %vm256_vm2, %v413_v46, -inf  ;;  %v732_v20 = vsel %vm256_vm2, %v720_v17, -inf }
 0x4a9   :  { %428 = vmax.xlane.f32.xlu0 %v427_v52  ;;  %v436_v56 = vsel %vm256_vm2, %v424_v54, -inf  ;;  %v726_v19 = vsel %vm256_vm2, %v712_v15, -inf }
 0x4aa   :  { %v430_v53 = vsel %vm256_vm2, %v416_v51, -inf }
 0x4ab   :  { %431 = vmax.xlane.f32.xlu1 %v430_v53 }
 0x4ad   :  { %434 = vmax.xlane.f32.xlu0 %v433_v55 }
 0x4b1   :  { %437 = vmax.xlane.f32.xlu0 %v436_v56 }
 0x536   :  { %v429_v57 = vpop.xlane.xlu0 %428 }
 0x537   :  { %v439_v58 = vsub.f32 %v413_v46, %v429_v57 }
 0x538   :  { %v432_v59 = vpop.xlane.xlu1 %431 }
 0x539   :  { %v443_v60 = vmul.f32 1.442695, %v439_v58  ;;  %v440_v61 = vsub.f32 %v416_v51, %v432_v59 }
 0x53a   :  { %v435_v62 = vpop.xlane.xlu0 %434 }
 0x53b   :  { %1431 = vpow2.f32 %v443_v60  ;;  %v445_v63 = vmul.f32 1.442695, %v440_v61  ;;  %v441_v0 = vsub.f32 %v421_v50, %v435_v62 }
 0x53d   :  { %1433 = vpow2.f32 %v445_v63  ;;  %v447_v1 = vmul.f32 1.442695, %v441_v0 }
 0x53e   :  { %v438_v2 = vpop.xlane.xlu0 %437 }
 0x53f   :  { %1435 = vpow2.f32 %v447_v1  ;;  %v442_v3 = vsub.f32 %v424_v54, %v438_v2 }
 0x541   :  { %v449_v4 = vmul.f32 1.442695, %v442_v3 }
 0x543   :  { %1437 = vpow2.f32 %v449_v4 }
 0x545   :  { %v1432_v5 = vpop.eup %1431 }
 0x546   :  { %v451_v6 = vsel %vm256_vm2, %v1432_v5, 0.0 }
 0x547   :  { %v1434_v7 = vpop.eup %1433  ;;  %452 = vadd.xlane.f32.xlu1 %v451_v6  ;;  %v1412_v6 = vld [vmem:[%s1811_s3] sm:$0xff]  }
 0x548   :  { %v454_v8 = vsel %vm256_vm2, %v1434_v7, 0.0 }
 0x549   :  { %v1436_v9 = vpop.eup %1435  ;;  %455 = vadd.xlane.f32.xlu0 %v454_v8 }
 0x54a   :  { %v457_v10 = vsel %vm256_vm2, %v1436_v9, 0.0 }
 0x54b   :  { %458 = vadd.xlane.f32.xlu1 %v457_v10 }
 0x54d   :  { %v1438_v11 = vpop.eup %1437 }
 0x54e   :  { %v460_v12 = vsel %vm256_vm2, %v1438_v11, 0.0 }
 0x54f   :  { %461 = vadd.xlane.f32.xlu0 %v460_v12 }
 0x55c   :  { %899 = vrot.lane.b32.xlu1 %v1601_v28, %s1508_s28 }
 0x565   :  { %901 = vrot.lane.b32.xlu0 %v1599_v27, %s1508_s28 }
 0x580   :  { %724 = vmax.xlane.f32.xlu1 %v723_v16 }
 0x584   :  { %730 = vmax.xlane.f32.xlu1 %v729_v18  ;;  %727 = vmax.xlane.f32.xlu0 %v726_v19 }
 0x588   :  { %733 = vmax.xlane.f32.xlu0 %v732_v20 }
 0x5d4   :  { %v453_v21 = vpop.xlane.xlu1 %452 }
 0x5d5   :  { %1439 = vrcp.f32 %v453_v21 }
 0x5d6   :  { %v456_v22 = vpop.xlane.xlu0 %455 }
 0x5d7   :  { %1441 = vrcp.f32 %v456_v22 }
 0x5d8   :  { %v459_v23 = vpop.xlane.xlu1 %458 }
 0x5d9   :  { %1443 = vrcp.f32 %v459_v23 }
 0x5dc   :  { %v462_v24 = vpop.xlane.xlu0 %461  ;;  %v900_v25 = vpop.permute.xlu1 %899 }
 0x5dd   :  { %1445 = vrcp.f32 %v462_v24  ;;  %1345 = vmatprep.mubr.msk.bf16.mxu0 %vm194_vm1, %v900_v25 }
 0x5df   :  { %v1440_v26 = vpop.eup %1439 }
 0x5e0   :  { %v902_v29 = vpop.permute.xlu0 %901  ;;  %v467_v40 = vmul.f32 %v1440_v26, %v1432_v5  ;;  %v1411_v5 = vld [vmem:[%s1811_s3 + $0x8] sm:$0xff]  }
 0x5e1   :  { %v1442_v35 = vpop.eup %1441  ;;  %1346 = vmatmul.mubr.msk.bf16.vlgmr.msra.gmra.mrb[8].mxu0 %vm194_vm1, %v902_v29  ;;  %1307 = vmatprep.subr.bf16.mxu1 %v1411_v5 }
 0x5e2   :  { %v468_v41 = vmul.f32 %v1442_v35, %v1434_v7 }
 0x5e3   :  { %v1444_v43 = vpop.eup %1443 }
 0x5e4   :  { %v471_v42 = vpack.c.bf16 %v468_v41, %v467_v40  ;;  %v469_v46 = vmul.f32 %v1444_v43, %v1436_v9 }
 0x5e6   :  { %1303 = vmatprep.mubr.msk.bf16.mxu1 %vm256_vm2, %v471_v42 }
 0x5e7   :  { %v1446_v44 = vpop.eup %1445 }
 0x5e8   :  { %v470_v47 = vmul.f32 %v1446_v44, %v1438_v11 }
 0x5ea   :  { %v472_v48 = vpack.c.bf16 %v470_v47, %v469_v46 }
 0x5ec   :  { %1304 = vmatmul.mubr.msk.bf16.vlgmr.msra.gmra.mrb[12].mxu1 %vm256_vm2, %v472_v48 }
 0x5ed   :  { %1308 = vmatpush3.bf16.msra.mxu1 %v1411_v5 }
 0x5ee   :  { %1313 = vmatprep.subr.bf16.mxu1 %v1412_v6 }
 0x60d   :  { %v725_v49 = vpop.xlane.xlu1 %724 }
 0x60e   :  { %v735_v50 = vsub.f32 %v709_v13, %v725_v49 }
 0x610   :  { %v739_v51 = vmul.f32 1.442695, %v735_v50 }
 0x611   :  { %v728_v52 = vpop.xlane.xlu0 %727  ;;  %v731_v53 = vpop.xlane.xlu1 %730 }
 0x612   :  { %1447 = vpow2.f32 %v739_v51  ;;  %v736_v54 = vsub.f32 %v712_v15, %v728_v52  ;;  %v737_v55 = vsub.f32 %v717_v14, %v731_v53 }
 0x614   :  { %v741_v56 = vmul.f32 1.442695, %v736_v54  ;;  %v743_v57 = vmul.f32 1.442695, %v737_v55 }
 0x615   :  { %v734_v58 = vpop.xlane.xlu0 %733 }
 0x616   :  { %1449 = vpow2.f32 %v741_v56  ;;  %v738_v59 = vsub.f32 %v720_v17, %v734_v58 }
 0x617   :  { %1451 = vpow2.f32 %v743_v57 }
 0x618   :  { %v745_v60 = vmul.f32 1.442695, %v738_v59 }
 0x61a   :  { %1453 = vpow2.f32 %v745_v60 }
 0x61c   :  { %v1448_v61 = vpop.eup %1447 }
 0x61d   :  { %v747_v62 = vsel %vm256_vm2, %v1448_v61, 0.0 }
 0x61e   :  { %748 = vadd.xlane.f32.xlu1 %v747_v62 }
 0x620   :  { %v1450_v63 = vpop.eup %1449 }
 0x621   :  { %v1734_v0 = vpop.eup %1451  ;;  %v750_v1 = vsel %vm256_vm2, %v1450_v63, 0.0 }
 0x622   :  { %751 = vadd.xlane.f32.xlu0 %v750_v1  ;;  %v753_v2 = vsel %vm256_vm2, %v1734_v0, 0.0 }
 0x623   :  { %754 = vadd.xlane.f32.xlu1 %v753_v2 }
 0x624   :  { %v1454_v3 = vpop.eup %1453 }
 0x625   :  { %v756_v4 = vsel %vm256_vm2, %v1454_v3, 0.0 }
 0x626   :  { %757 = vadd.xlane.f32.xlu0 %v756_v4  ;;  %v1414_v4 = vld [vmem:[%s1811_s3 + $0x18] sm:$0xff]  }
 0x634   :  { %769 = vrot.lane.b32.xlu1 %v1601_v28, %s1509_s29 }
 0x63c   :  { %771 = vrot.lane.b32.xlu0 %v1599_v27, %s1509_s29 }
 0x6ab   :  { %v749_v15 = vpop.xlane.xlu1 %748 }
 0x6b0   :  { %v755_v18 = vpop.xlane.xlu1 %754 }
 0x6b4   :  { %v1347_v7 = vpop.f32.mrb[8].mxu0  ;;  %v770_v23 = vpop.permute.xlu1 %769 }
 0x6b5   :  { %v943_v8 = vpop.f32.mrb[9].mxu0  ;;  %v1750_v28 = vadd.f32 %v1347_v7, %v1630_v33 }
 0x6b6   :  { %v944_v9 = vadd.f32 %v943_v8, %v1635_v34  ;;  %v1348_v10 = vpop.f32.mrb[10].mxu0  ;;  %v752_v34 = vpop.xlane.xlu0 %751 }
 0x6b7   :  { %v946_v11 = vpop.f32.mrb[11].mxu0  ;;  %v955_v13 = vadd.f32 %v1348_v10, %v1650_v45  ;;  %v964_v16 = vsel %vm256_vm2, %v1750_v28, -inf  ;;  %1455 = vrcp.f32 %v752_v34 }
 0x6b8   :  { %v947_v27 = vadd.f32 %v946_v11, %v1641_v38  ;;  %v958_v12 = vsel %vm256_vm2, %v944_v9, -inf  ;;  %1457 = vrcp.f32 %v749_v15 }
 0x6b9   :  { %959 = vmax.xlane.f32.xlu1 %v958_v12  ;;  %v967_v17 = vsel %vm256_vm2, %v955_v13, -inf }
 0x6ba   :  { %v961_v14 = vsel %vm256_vm2, %v947_v27, -inf  ;;  %v758_v22 = vpop.xlane.xlu0 %757 }
 0x6bb   :  { %962 = vmax.xlane.f32.xlu0 %v961_v14  ;;  %1459 = vrcp.f32 %v758_v22 }
 0x6bc   :  { %1461 = vrcp.f32 %v755_v18 }
 0x6bd   :  { %965 = vmax.xlane.f32.xlu1 %v964_v16 }
 0x6be   :  { %v772_v42 = vpop.permute.xlu0 %771 }
 0x6bf   :  { %v1305_v33 = vpop.f32.mrb[12].mxu1  ;;  %968 = vmax.xlane.f32.xlu0 %v967_v17 }
 0x6c0   :  { %v513_v38 = vpop.f32.mrb[13].mxu1 }
 0x6c1   :  { %v1306_v19 = vpop.f32.mrb[14].mxu1  ;;  %v1456_v24 = vpop.eup %1455 }
 0x6c2   :  { %v529_v20 = vpack.c.bf16 %v1306_v19, %v1305_v33  ;;  %v516_v45 = vpop.f32.mrb[15].mxu1  ;;  %v1458_v25 = vpop.eup %1457  ;;  %v764_v26 = vmul.f32 %v1456_v24, %v1450_v63 }
 0x6c3   :  { %v528_v21 = vpack.c.bf16 %v516_v45, %v513_v38  ;;  %v763_v29 = vmul.f32 %v1458_v25, %v1448_v61 }
 0x6c5   :  { %1309 = vmatprep.mubr.msk.bf16.mxu1 %vm194_vm1, %v528_v21  ;;  %v1460_v35 = vpop.eup %1459  ;;  %v767_v40 = vpack.c.bf16 %v764_v26, %v763_v29 }
 0x6c6   :  { %1310 = vmatmul.mubr.msk.bf16.vlgmr.msra.gmra.mrb[16].mxu1 %vm194_vm1, %v529_v20  ;;  %v1462_v41 = vpop.eup %1461  ;;  %v766_v31 = vmul.f32 %v1460_v35, %v1454_v3  ;;  %v1200_v20 = vld [vmem:[%s1812_s4] ss:$0 sm:$0xff]  ;;  %s1479_s4 = scalar_lea.vmem %s1149_s16, 512 }
 0x6c7   :  { %1314 = vmatpush3.bf16.msra.mxu1 %v1412_v6  ;;  %1315 = vmatprep.mubr.msk.bf16.mxu1 %vm194_vm1, %v364_v39  ;;  %v765_v39 = vmul.f32 %v1462_v41, %v1734_v0  ;;  %p1480_p0 = scmp.ne.s32.totalorder %s1149_s16, %s1479_s4  ;;  %p1485_p2 = scmp.lt.s32.totalorder %s1479_s4, %s1479_s4 }
 0x6c8   :  { %1327 = vmatprep.subr.bf16.mxu1 %v770_v23 }
 0x6c9   :  { %v768_v43 = vpack.c.bf16 %v766_v31, %v765_v39  ;;  %p1486_p3 = por %p1485_p2, %p1484_p1 }
 0x6cb   :  { %p1487_p4 = pnand %p1486_p3, %p1480_p0 }
 0x6d2   :  { %1316 = vmatmul.mubr.msk.bf16.vlgmr.msra.gmra.mrb[16].mxu1 %vm194_vm1, %v365_v36 }
 0x6d3   :  { %1328 = vmatpush3.bf16.msra.mxu1 %v770_v23  ;;  %1331 = vmatprep.mubr.msk.bf16.mxu1 %vm256_vm2, %v767_v40 }
 0x6d4   :  { %1329 = vmatprep.subr.bf16.mxu1 %v772_v42 }
 0x6d7   :  { %1330 = vmatpush3.bf16.msra.mxu1 %v772_v42 }
 0x6d8   :  { %1335 = vmatprep.subr.bf16.mxu1 %v1413_v37 }
 0x6da   :  { %1332 = vmatmul.mubr.msk.bf16.vlgmr.msra.gmra.mrb[20].mxu1 %vm256_vm2, %v768_v43 }
 0x6db   :  { %1336 = vmatpush3.bf16.msra.mxu1 %v1413_v37 }
 0x6dc   :  { %1349 = vmatprep.subr.bf16.mxu1 %v770_v23 }
 0x746   :  { %v960_v30 = vpop.xlane.xlu1 %959 }
 0x747   :  { %v970_v32 = vsub.f32 %v944_v9, %v960_v30 }
 0x748   :  { %v963_v36 = vpop.xlane.xlu0 %962 }
 0x749   :  { %v974_v44 = vmul.f32 1.442695, %v970_v32  ;;  %v971_v46 = vsub.f32 %v947_v27, %v963_v36 }
 0x74a   :  { %v966_v47 = vpop.xlane.xlu1 %965 }
 0x74b   :  { %1463 = vpow2.f32 %v974_v44  ;;  %v976_v48 = vmul.f32 1.442695, %v971_v46  ;;  %v972_v49 = vsub.f32 %v1750_v28, %v966_v47 }
 0x74c   :  { %v969_v50 = vpop.xlane.xlu0 %968 }
 0x74d   :  { %1465 = vpow2.f32 %v976_v48  ;;  %v978_v51 = vmul.f32 1.442695, %v972_v49  ;;  %v973_v52 = vsub.f32 %v955_v13, %v969_v50 }
 0x74f   :  { %1467 = vpow2.f32 %v978_v51  ;;  %v980_v53 = vmul.f32 1.442695, %v973_v52 }
 0x751   :  { %1469 = vpow2.f32 %v980_v53 }
 0x755   :  { %v1464_v54 = vpop.eup %1463 }
 0x756   :  { %v982_v55 = vsel %vm256_vm2, %v1464_v54, 0.0 }
 0x757   :  { %v1466_v56 = vpop.eup %1465  ;;  %983 = vadd.xlane.f32.xlu1 %v982_v55 }
 0x758   :  { %v985_v57 = vsel %vm256_vm2, %v1466_v56, 0.0 }
 0x759   :  { %v1468_v58 = vpop.eup %1467  ;;  %986 = vadd.xlane.f32.xlu0 %v985_v57 }
 0x75a   :  { %v988_v59 = vsel %vm256_vm2, %v1468_v58, 0.0 }
 0x75b   :  { %v1470_v60 = vpop.eup %1469  ;;  %989 = vadd.xlane.f32.xlu1 %v988_v59 }
 0x75c   :  { %v991_v61 = vsel %vm256_vm2, %v1470_v60, 0.0 }
 0x75d   :  { %992 = vadd.xlane.f32.xlu0 %v991_v61 }
 0x7ad   :  { %v1333_v62 = vpop.f32.mrb[20].mxu1 }
 0x7ae   :  { %v815_v63 = vpop.f32.mrb[21].mxu1 }
 0x7af   :  { %v1334_v0 = vpop.f32.mrb[22].mxu1 }
 0x7b0   :  { %v831_v1 = vpack.c.bf16 %v1334_v0, %v1333_v62  ;;  %v818_v2 = vpop.f32.mrb[23].mxu1 }
 0x7b1   :  { %v830_v3 = vpack.c.bf16 %v818_v2, %v815_v63 }
 0x7b3   :  { %1337 = vmatprep.mubr.msk.bf16.mxu1 %vm194_vm1, %v830_v3 }
 0x7b4   :  { %1338 = vmatmul.mubr.msk.bf16.vlgmr.msra.gmra.mrb[16].mxu1 %vm194_vm1, %v831_v1 }
 0x7b5   :  { %1350 = vmatpush3.bf16.msra.mxu1 %v770_v23 }
 0x7b6   :  { %1351 = vmatprep.subr.bf16.mxu1 %v772_v42 }
 0x7b9   :  { %1352 = vmatpush3.bf16.msra.mxu1 %v772_v42 }
 0x7ba   :  { %1357 = vmatprep.subr.bf16.mxu1 %v1414_v4 }
 0x7e4   :  { %v984_v5 = vpop.xlane.xlu1 %983 }
 0x7e5   :  { %1471 = vrcp.f32 %v984_v5 }
 0x7e6   :  { %v987_v6 = vpop.xlane.xlu0 %986 }
 0x7e7   :  { %1473 = vrcp.f32 %v987_v6 }
 0x7e8   :  { %v990_v7 = vpop.xlane.xlu1 %989 }
 0x7e9   :  { %1475 = vrcp.f32 %v990_v7 }
 0x7ea   :  { %v993_v8 = vpop.xlane.xlu0 %992 }
 0x7eb   :  { %1477 = vrcp.f32 %v993_v8 }
 0x7ef   :  { %v1472_v9 = vpop.eup %1471 }
 0x7f0   :  { %v998_v11 = vmul.f32 %v1472_v9, %v1464_v54 }
 0x7f1   :  { %v1474_v10 = vpop.eup %1473 }
 0x7f2   :  { %v999_v28 = vmul.f32 %v1474_v10, %v1466_v56 }
 0x7f3   :  { %v1476_v27 = vpop.eup %1475 }
 0x7f4   :  { %v1002_v12 = vpack.c.bf16 %v999_v28, %v998_v11  ;;  %v1000_v14 = vmul.f32 %v1476_v27, %v1468_v58 }
 0x7f5   :  { %v1478_v13 = vpop.eup %1477 }
 0x7f6   :  { %v1001_v15 = vmul.f32 %v1478_v13, %v1470_v60  ;;  %1353 = vmatprep.mubr.msk.bf16.mxu1 %vm256_vm2, %v1002_v12 }
 0x7f8   :  { %v1003_v16 = vpack.c.bf16 %v1001_v15, %v1000_v14 }
 0x7fa   :  { %1354 = vmatmul.mubr.msk.bf16.vlgmr.msra.gmra.mrb[24].mxu1 %vm256_vm2, %v1003_v16 }
 0x7fb   :  { %1358 = vmatpush3.bf16.msra.mxu1 %v1414_v4 }
 0x8cd   :  { %v1355_v34 = vpop.f32.mrb[24].mxu1 }
 0x8ce   :  { %v1044_v17 = vpop.f32.mrb[25].mxu1 }
 0x8cf   :  { %v1356_v33 = vpop.f32.mrb[26].mxu1 }
 0x8d0   :  { %v1060_v38 = vpack.c.bf16 %v1356_v33, %v1355_v34  ;;  %v1047_v18 = vpop.f32.mrb[27].mxu1 }
 0x8d1   :  { %v1059_v19 = vpack.c.bf16 %v1047_v18, %v1044_v17 }
 0x8d3   :  { %1359 = vmatprep.mubr.msk.bf16.mxu1 %vm194_vm1, %v1059_v19 }
 0x8d4   :  { %1360 = vmatmul.mubr.msk.bf16.vlgmr.msra.gmra.mrb[16].mxu1 %vm194_vm1, %v1060_v38 }
 0x9a7   :  { %v1361_v45 = vpop.f32.mrb[16].mxu1 }
 0x9a8   :  { %v1137_v21 = vadd.f32 %v1361_v45, %v1200_v20  ;;  %v1109_v22 = vpop.f32.mrb[17].mxu1 }
 0x9a9   :  { %v1135_v23 = vadd.f32 %v1200_v20, %v1109_v22  ;;  %v1362_v24 = vpop.f32.mrb[18].mxu1 }
 0x9aa   :  { %1141 = vst.msk [vmem:[#allocation2 + $0x10] sm:$0xff] %vm102_vm0, %v1137_v21  ;;  %v1138_v25 = vadd.f32 %v1362_v24, %v1200_v20  ;;  %v1112_v26 = vpop.f32.mrb[19].mxu1 }
 0x9ab   :  { %1139 = vst.msk [vmem:[#allocation2] sm:$0xff] %vm102_vm0, %v1135_v23  ;;  %v1136_v29 = vadd.f32 %v1200_v20, %v1112_v26 }
 0x9ac   :  { %1142 = vst.msk [vmem:[#allocation2 + $0x18] sm:$0xff] %vm102_vm0, %v1138_v25 }
 0x9ad   :  { %1140 = vst.msk [vmem:[#allocation2 + $0x8] sm:$0xff] %vm102_vm0, %v1136_v29 }
 0x9ae   :  { %1490 = shalt.err (!%p1487_p4)
}
 0x9af   :  { %s1491_s0 = scalar_lea.hbm %s1814_s6, 512 }
 0x9b0   :  { %p1492_p5 = scmp.ne.s32.totalorder %s1814_s6, %s1491_s0  ;;  %p1495_p6 = scmp.lt.u32.totalorder %s1491_s0, %s1814_s6 }
 0x9b2   :  { %p1497_p7 = pnand %p1495_p6, %p1492_p5 }
 0x9b4   :  { %1500 = shalt.err (!%p1497_p7)
}
 0x9b5   :  { %s1511_s21 = smov 128   ;;  %s1512_s22 = smov 8  }
 0x9b6   :  { %1154 = dma.vmem_to_hbm [thread:$0]  %s1149_s16, 512, %s1814_s6, [#allocation3], %s1511_s21, %s1511_s21, %s1512_s22  }
 0x9b7   :  { %1501 = dma.done.wait [#allocation3], 512  }
 0x9b8   :  { %1502 = vsyncadd [#allocation3], 4294966784 }
 0x9b9   :  { %1158 = vsyncpa [#allocation3], 1 }

</bundles_post_ra>
